<compile_context>
chip_gen: v5e
topology: v5e:2x2
jax: 0.10.0
libtpu: 0.0.40
codegen_flags: <defaults>
</compile_context>

<pallas_src>
import functools

import jax
import jax.numpy as jnp
from jax import lax
from jax.experimental import pallas as pl
from jax.experimental.pallas import tpu as pltpu

_UNROLL = 8  # manual unroll factor for the per-token loops


def _round_up(x, m):
    return ((x + m - 1) // m) * m


def _vmem_gather_kernel(ids_ref, w_ref, o_ref, *, tile_t):
    """In-core gather from a VMEM-resident embedding table.

    ids_ref : SMEM int32 (T_pad,)   -- scalar-prefetched final token ids
    w_ref   : VMEM f32   (V, D)     -- whole table, resident (constant block idx)
    o_ref   : VMEM f32   (tile_t, D)
    """
    base = pl.program_id(0) * tile_t

    def chunk(c, carry):
        t0 = c * _UNROLL
        for u in range(_UNROLL):            # manual unroll: co-issue addr math + ld/st
            t = t0 + u
            row = ids_ref[base + t]         # scalar SMEM read
            o_ref[pl.ds(t, 1), :] = w_ref[pl.ds(row, 1), :]
        return carry

    lax.fori_loop(0, tile_t // _UNROLL, chunk, 0)


def _hbm_gather_kernel(ids_ref, w_hbm, o_ref, sem, *, tile_t):
    """DMA row-gather for tables too large for VMEM.

    ids_ref : SMEM int32 (T_pad,)
    w_hbm   : HBM  f32   (V, D)      -- never fully in VMEM
    o_ref   : VMEM f32   (tile_t, D) -- rows land here directly (no scratch)
    sem     : DMA semaphore (shared; one aggregate wait at the end)
    """
    base = pl.program_id(0) * tile_t

    def chunk(c, carry):
        t0 = c * _UNROLL
        for u in range(_UNROLL):            # unrolled descriptor issue
            t = t0 + u
            row = ids_ref[base + t]
            pltpu.make_async_copy(w_hbm.at[row], o_ref.at[t], sem).start()
        return carry

    lax.fori_loop(0, tile_t // _UNROLL, chunk, 0)

    # Single aggregate wait: the DMA semaphore counts bytes, and the tile_t row
    # copies together cover exactly the o_ref tile, so one wait sized like the
    # full tile consumes all completions.
    pltpu.make_async_copy(o_ref, o_ref, sem).wait()


def word_embedder_forward(word_ids, n_words, weights, *, drop_mask=None,
                          drop_rng=None, word_dropout=0.0, training=False,
                          unknown=1, pad=0, force_hbm_gather=False):
    """Equivalent of WordEmbedder.forward: returns {'embeddings': (B, S, D)}."""
    B, S = word_ids.shape
    V, D = weights.shape
    T = B * S
    weights = weights.astype(jnp.float32)

    # --- WordDropout semantics (training only); same order as the module:
    #       1) dropped positions -> unknown id
    #       2) positions past n_words -> pad id
    ids = word_ids.astype(jnp.int32)
    if training:
        if drop_mask is None and drop_rng is not None and word_dropout > 0.0:
            # TODO(synk): torch's stateful Tensor.bernoulli_ RNG has no Pallas
            # equivalent; the drop mask is sampled here with jax.random.
            drop_mask = jax.random.bernoulli(drop_rng, word_dropout, (B, S))
        if drop_mask is not None:
            ids = jnp.where(drop_mask != 0, jnp.int32(unknown), ids)
        pos = jnp.arange(S, dtype=jnp.int32)[None, :]
        ids = jnp.where(pos >= n_words.astype(jnp.int32)[:, None],
                        jnp.int32(pad), ids)
    # torch.nn.Embedding raises on out-of-range ids; a gather would read out of
    # bounds silently, so clamp defensively.
    ids = jnp.clip(ids, 0, V - 1)

    table_bytes = V * D * 4
    use_vmem_table = (table_bytes <= 10 * (1 << 20)) and not force_hbm_gather

    # Token tile: as large as possible (amortizes per-grid-step overhead, lets
    # megacore split work) while keeping the double-buffered output tile small
    # and, on the HBM path, bounding outstanding DMAs on the shared semaphore.
    cap = 2048 if use_vmem_table else 512
    cap = min(cap, max(_UNROLL, ((2 << 20) // (4 * D)) // _UNROLL * _UNROLL))
    t_pad = _round_up(T, _UNROLL)
    tile_t = t_pad if t_pad <= cap else cap
    t_pad = _round_up(T, tile_t)

    # TODO(synk): for very long token streams (B*S >> 100K) the whole-stream
    # scalar prefetch should become a per-tile SMEM BlockSpec to bound SMEM use.
    ids_flat = ids.reshape(T)
    if t_pad != T:
        ids_flat = jnp.pad(ids_flat, (0, t_pad - T))   # padding gathers row 0, sliced off

    if use_vmem_table:
        kernel = functools.partial(_vmem_gather_kernel, tile_t=tile_t)
        in_specs = [pl.BlockSpec((V, D), lambda i, ids_smem: (0, 0))]  # resident in VMEM
        scratch = []
        read_bytes = table_bytes
    else:
        kernel = functools.partial(_hbm_gather_kernel, tile_t=tile_t)
        in_specs = [pl.BlockSpec(memory_space=pl.ANY)]                 # table stays in HBM
        scratch = [pltpu.SemaphoreType.DMA(())]
        read_bytes = t_pad * D * 4

    out = pl.pallas_call(
        kernel,
        out_shape=jax.ShapeDtypeStruct((t_pad, D), jnp.float32),
        grid_spec=pltpu.PrefetchScalarGridSpec(
            num_scalar_prefetch=1,                       # final ids -> SMEM
            grid=(t_pad // tile_t,),
            in_specs=in_specs,
            out_specs=pl.BlockSpec((tile_t, D), lambda i, ids_smem: (i, 0)),
            scratch_shapes=scratch,
        ),
        compiler_params=pltpu.CompilerParams(
            dimension_semantics=("parallel",),           # v7x: split tiles across TCs
            vmem_limit_bytes=32 * (1 << 20),             # v5e default is only 16 MiB
        ),
        cost_estimate=pl.CostEstimate(
            flops=0, transcendentals=0,
            bytes_accessed=int(read_bytes + t_pad * D * 4 + t_pad * 4)),
    )(ids_flat, weights)

    emb = out[:T].reshape(B, S, D)
    return {"embeddings": emb}


if __name__ == "__main__":
    # Small shapes consistent with the module: vocab=50, embed_dim=32, batch=2, seq=8.
    B, S, V, D = 2, 8, 50, 32
    word_dropout_p = 0.25
    init_std = 0.001

    key = jax.random.PRNGKey(0)
    k_w, k_ids, k_drop, k_ids2 = jax.random.split(key, 4)

    # Deterministic "parameters": embedding table ~ N(0, init_std), like __init__.
    W = jax.random.normal(k_w, (V, D), jnp.float32) * init_std
    word_ids = jax.random.randint(k_ids, (B, S), 0, V, jnp.int32)
    n_words = jnp.array([5, 8], jnp.int32)
    drop_mask = jax.random.bernoulli(k_drop, word_dropout_p, (B, S)).astype(jnp.int32)

    # --- eval-mode forward (WordDropout is identity); fast resident-table path ---
    out_eval = word_embedder_forward(word_ids, n_words, W, training=False)
    emb_eval = jax.block_until_ready(out_eval["embeddings"])
    ref_eval = W[word_ids]
    assert emb_eval.shape == (B, S, D)
    assert emb_eval.dtype == jnp.float32
    assert jnp.array_equal(emb_eval, ref_eval)

    # --- training-mode forward (word dropout + pad masking, deterministic mask) ---
    out_train = word_embedder_forward(word_ids, n_words, W,
                                      drop_mask=drop_mask, training=True)
    emb_train = jax.block_until_ready(out_train["embeddings"])
    pos_ref = jnp.arange(S)[None, :]
    ids_masked = jnp.where(drop_mask != 0, 1, word_ids)                  # unknown = 1
    ids_masked = jnp.where(pos_ref >= n_words[:, None], 0, ids_masked)   # pad = 0
    ref_train = W[ids_masked]
    assert jnp.array_equal(emb_train, ref_train)

    # --- large-vocab fallback path (HBM table + direct-to-output DMA gather), forced ---
    out_hbm = word_embedder_forward(word_ids, n_words, W, training=False,
                                    force_hbm_gather=True)
    emb_hbm = jax.block_until_ready(out_hbm["embeddings"])
    assert jnp.array_equal(emb_hbm, ref_eval)

    # --- multi-tile fast path (grid > 1, token padding, parallel axis) ---
    B2, S2 = 4, 700                                      # T = 2800 > 2048 -> 2 tiles
    word_ids2 = jax.random.randint(k_ids2, (B2, S2), 0, V, jnp.int32)
    n_words2 = jnp.full((B2,), S2, jnp.int32)
    out2 = word_embedder_forward(word_ids2, n_words2, W, training=False)
    emb2 = jax.block_until_ready(out2["embeddings"])
    assert jnp.array_equal(emb2, W[word_ids2])

    print("KERNEL_OK")
</pallas_src>

<mosaic_0001>
module attributes {stable_mosaic.version = 11 : i64} {
  func.func @_vmem_gather_kernel(%arg0: i32, %arg1: memref<16xi32, #tpu.memory_space<smem>>, %arg2: memref<50x32xf32, #tpu.memory_space<vmem>>, %arg3: memref<16x32xf32, #tpu.memory_space<vmem>>) attributes {dimension_semantics = [#tpu.dimension_semantics<parallel>], iteration_bounds = array<i64: 1>, scalar_prefetch = 1 : i64, scratch_operands = 0 : i64, tpu.core_type = #tpu.core_type<tc>, window_params = [{pipeline_mode = #tpu.pipeline_mode<synchronous>, transform_indices = @transform_0, window_bounds = array<i64: 50, 32>}, {transform_indices = @transform_1, window_bounds = array<i64: 16, 32>}]} {
    %c16_i32 = arith.constant 16 : i32
    %0 = arith.muli %arg0, %c16_i32 : i32
    %c0_i32 = arith.constant 0 : i32
    %c2_i32 = arith.constant 2 : i32
    %1 = arith.addi %c0_i32, %c2_i32 : i32
    %c1_i32 = arith.constant 1 : i32
    scf.for %arg4 = %c0_i32 to %1 step %c1_i32  : i32 {
      %c8_i32 = arith.constant 8 : i32
      %2 = arith.muli %arg4, %c8_i32 : i32
      %c0_i32_1 = arith.constant 0 : i32
      %3 = arith.addi %2, %c0_i32_1 : i32
      %4 = arith.addi %0, %3 : i32
      %5 = arith.index_cast %4 : i32 to index
      %6 = memref.load %arg1[%5] : memref<16xi32, #tpu.memory_space<smem>>
      %7 = arith.index_cast %6 : i32 to index
      %c0 = arith.constant 0 : index
      %8 = vector.load %arg2[%7, %c0] : memref<50x32xf32, #tpu.memory_space<vmem>>, vector<1x32xf32>
      %9 = arith.index_cast %3 : i32 to index
      %c0_2 = arith.constant 0 : index
      %10 = vector.load %arg3[%9, %c0_2] : memref<16x32xf32, #tpu.memory_space<vmem>>, vector<1x32xf32>
      tpu.vector_store %arg3[%9, %c0_2], %8 {strides = array<i32>} : memref<16x32xf32, #tpu.memory_space<vmem>>, vector<1x32xf32>,
      %c1_i32_3 = arith.constant 1 : i32
      %11 = arith.addi %2, %c1_i32_3 : i32
      %12 = arith.addi %0, %11 : i32
      %13 = arith.index_cast %12 : i32 to index
      %14 = memref.load %arg1[%13] : memref<16xi32, #tpu.memory_space<smem>>
      %15 = arith.index_cast %14 : i32 to index
      %c0_4 = arith.constant 0 : index
      %16 = vector.load %arg2[%15, %c0_4] : memref<50x32xf32, #tpu.memory_space<vmem>>, vector<1x32xf32>
      %17 = arith.index_cast %11 : i32 to index
      %c0_5 = arith.constant 0 : index
      %18 = vector.load %arg3[%17, %c0_5] : memref<16x32xf32, #tpu.memory_space<vmem>>, vector<1x32xf32>
      tpu.vector_store %arg3[%17, %c0_5], %16 {strides = array<i32>} : memref<16x32xf32, #tpu.memory_space<vmem>>, vector<1x32xf32>,
      %c2_i32_6 = arith.constant 2 : i32
      %19 = arith.addi %2, %c2_i32_6 : i32
      %20 = arith.addi %0, %19 : i32
      %21 = arith.index_cast %20 : i32 to index
      %22 = memref.load %arg1[%21] : memref<16xi32, #tpu.memory_space<smem>>
      %23 = arith.index_cast %22 : i32 to index
      %c0_7 = arith.constant 0 : index
      %24 = vector.load %arg2[%23, %c0_7] : memref<50x32xf32, #tpu.memory_space<vmem>>, vector<1x32xf32>
      %25 = arith.index_cast %19 : i32 to index
      %c0_8 = arith.constant 0 : index
      %26 = vector.load %arg3[%25, %c0_8] : memref<16x32xf32, #tpu.memory_space<vmem>>, vector<1x32xf32>
      tpu.vector_store %arg3[%25, %c0_8], %24 {strides = array<i32>} : memref<16x32xf32, #tpu.memory_space<vmem>>, vector<1x32xf32>,
      %c3_i32 = arith.constant 3 : i32
      %27 = arith.addi %2, %c3_i32 : i32
      %28 = arith.addi %0, %27 : i32
      %29 = arith.index_cast %28 : i32 to index
      %30 = memref.load %arg1[%29] : memref<16xi32, #tpu.memory_space<smem>>
      %31 = arith.index_cast %30 : i32 to index
      %c0_9 = arith.constant 0 : index
      %32 = vector.load %arg2[%31, %c0_9] : memref<50x32xf32, #tpu.memory_space<vmem>>, vector<1x32xf32>
      %33 = arith.index_cast %27 : i32 to index
      %c0_10 = arith.constant 0 : index
      %34 = vector.load %arg3[%33, %c0_10] : memref<16x32xf32, #tpu.memory_space<vmem>>, vector<1x32xf32>
      tpu.vector_store %arg3[%33, %c0_10], %32 {strides = array<i32>} : memref<16x32xf32, #tpu.memory_space<vmem>>, vector<1x32xf32>,
      %c4_i32 = arith.constant 4 : i32
      %35 = arith.addi %2, %c4_i32 : i32
      %36 = arith.addi %0, %35 : i32
      %37 = arith.index_cast %36 : i32 to index
      %38 = memref.load %arg1[%37] : memref<16xi32, #tpu.memory_space<smem>>
      %39 = arith.index_cast %38 : i32 to index
      %c0_11 = arith.constant 0 : index
      %40 = vector.load %arg2[%39, %c0_11] : memref<50x32xf32, #tpu.memory_space<vmem>>, vector<1x32xf32>
      %41 = arith.index_cast %35 : i32 to index
      %c0_12 = arith.constant 0 : index
      %42 = vector.load %arg3[%41, %c0_12] : memref<16x32xf32, #tpu.memory_space<vmem>>, vector<1x32xf32>
      tpu.vector_store %arg3[%41, %c0_12], %40 {strides = array<i32>} : memref<16x32xf32, #tpu.memory_space<vmem>>, vector<1x32xf32>,
      %c5_i32 = arith.constant 5 : i32
      %43 = arith.addi %2, %c5_i32 : i32
      %44 = arith.addi %0, %43 : i32
      %45 = arith.index_cast %44 : i32 to index
      %46 = memref.load %arg1[%45] : memref<16xi32, #tpu.memory_space<smem>>
      %47 = arith.index_cast %46 : i32 to index
      %c0_13 = arith.constant 0 : index
      %48 = vector.load %arg2[%47, %c0_13] : memref<50x32xf32, #tpu.memory_space<vmem>>, vector<1x32xf32>
      %49 = arith.index_cast %43 : i32 to index
      %c0_14 = arith.constant 0 : index
      %50 = vector.load %arg3[%49, %c0_14] : memref<16x32xf32, #tpu.memory_space<vmem>>, vector<1x32xf32>
      tpu.vector_store %arg3[%49, %c0_14], %48 {strides = array<i32>} : memref<16x32xf32, #tpu.memory_space<vmem>>, vector<1x32xf32>,
      %c6_i32 = arith.constant 6 : i32
      %51 = arith.addi %2, %c6_i32 : i32
      %52 = arith.addi %0, %51 : i32
      %53 = arith.index_cast %52 : i32 to index
      %54 = memref.load %arg1[%53] : memref<16xi32, #tpu.memory_space<smem>>
      %55 = arith.index_cast %54 : i32 to index
      %c0_15 = arith.constant 0 : index
      %56 = vector.load %arg2[%55, %c0_15] : memref<50x32xf32, #tpu.memory_space<vmem>>, vector<1x32xf32>
      %57 = arith.index_cast %51 : i32 to index
      %c0_16 = arith.constant 0 : index
      %58 = vector.load %arg3[%57, %c0_16] : memref<16x32xf32, #tpu.memory_space<vmem>>, vector<1x32xf32>
      tpu.vector_store %arg3[%57, %c0_16], %56 {strides = array<i32>} : memref<16x32xf32, #tpu.memory_space<vmem>>, vector<1x32xf32>,
      %c7_i32 = arith.constant 7 : i32
      %59 = arith.addi %2, %c7_i32 : i32
      %60 = arith.addi %0, %59 : i32
      %61 = arith.index_cast %60 : i32 to index
      %62 = memref.load %arg1[%61] : memref<16xi32, #tpu.memory_space<smem>>
      %63 = arith.index_cast %62 : i32 to index
      %c0_17 = arith.constant 0 : index
      %64 = vector.load %arg2[%63, %c0_17] : memref<50x32xf32, #tpu.memory_space<vmem>>, vector<1x32xf32>
      %65 = arith.index_cast %59 : i32 to index
      %c0_18 = arith.constant 0 : index
      %66 = vector.load %arg3[%65, %c0_18] : memref<16x32xf32, #tpu.memory_space<vmem>>, vector<1x32xf32>
      tpu.vector_store %arg3[%65, %c0_18], %64 {strides = array<i32>} : memref<16x32xf32, #tpu.memory_space<vmem>>, vector<1x32xf32>,
    }
    %c2_i32_0 = arith.constant 2 : i32
    return
  }
  func.func @transform_0(%arg0: i32, %arg1: memref<16xi32, #tpu.memory_space<smem>>) -> (i32, i32) {
    %c0_i32 = arith.constant 0 : i32
    %c0_i32_0 = arith.constant 0 : i32
    %c0_i32_1 = arith.constant 0 : i32
    return %c0_i32, %c0_i32_0 : i32, i32
  }
  func.func @transform_1(%arg0: i32, %arg1: memref<16xi32, #tpu.memory_space<smem>>) -> (i32, i32) {
    %c0_i32 = arith.constant 0 : i32
    %c0_i32_0 = arith.constant 0 : i32
    return %arg0, %c0_i32 : i32, i32
  }
}

</mosaic_0001>

<bundles_post_ra>
// kernel: tpu_custom_call.1
= control target key start
LH: loop header
LB: loop body
LE: loop exit
PB: predicated region body
PF: predicated region fallthrough
CT: control target
= control target key end

     0   :  { %s211_s12 = smov [#allocation3]   ;;  %s277_s0 = inlined_call_operand.vmem [shape: s32[16], index: 0, kind: input, shape index: {}]   ;;  %s278_s1 = inlined_call_operand.vmem [shape: f32[50,32], index: 1, kind: input, shape index: {}]   ;;  %s279_s2 = inlined_call_operand.hbm [shape: f32[16,32], index: 2, kind: output, shape index: {}]  }
   0x1   :  { %s8_s11 = sshll.u32 %s277_s0, 4  ;;  %s9_s11 = int_to_ptr.vmem [resolvable:$true] %s8_s11 }
   0x2   :  { %11 = dma.vmem_to_smem %s9_s11, 16, %s211_s12, [#allocation2] }
   0x3   :  { %203 = dma.done.wait [#allocation2], 16 }
   0x4   :  { %204 = vsyncadd [#allocation2], 4294967280 }
   0x5   :  { %14 = sfence }
   0x6   :  { %15 = vsyncpa [#allocation5], 0  ;;  %s233_s13 = smov 0  }
   0x7 LB: > { %s136_s14 = sshll.u32 %s209_s13, 3  ;;  %vm31_vm0 = vcmask 253952   ;;  %s24_s13 = sadd.s32 1, %s209_s13   ;;  %s209_s13 = sphi %s233_s13, %s24_s13  }
   0x8   : > { %s27_s15 = sld [smem:[#allocation3 + %s136_s14]]  ;;  %s33_s16 = sadd.s32 1, %s136_s14 }
   0x9   : > { %s40_s17 = sadd.s32 2, %s136_s14  ;;  %s35_s0 = sld [smem:[#allocation3 + %s33_s16]] }
   0xa   : > { %s47_s18 = sadd.s32 3, %s136_s14  ;;  %s42_s19 = sld [smem:[#allocation3 + %s40_s17]] }
   0xb   : > { %s54_s20 = sadd.s32 4, %s136_s14  ;;  %s49_s21 = sld [smem:[#allocation3 + %s47_s18]] }
   0xc   : > { %s61_s22 = sadd.s32 5, %s136_s14  ;;  %s56_s23 = sld [smem:[#allocation3 + %s54_s20]] }
   0xd   : > { %s68_s24 = sadd.s32 6, %s136_s14  ;;  %s63_s28 = sld [smem:[#allocation3 + %s61_s22]] }
   0xe   : > { %s28_s27 = scalar_lea.vmem %s278_s1, %s27_s15  ;;  %s70_s29 = sld [smem:[#allocation3 + %s68_s24]] }
   0xf   : > { %v29_v0 = vld [vmem:[%s28_s27] sm:$0x1]  ;;  %s75_s30 = sadd.s32 7, %s136_s14  ;;  %s30_s3 = scalar_lea.vmem [#allocation4], %s136_s14 }
  0x10   : > { %32 = vst.msk [vmem:[%s30_s3] sm:$0x1] %vm31_vm0, %v29_v0  ;;  %s36_s6 = scalar_lea.vmem %s278_s1, %s35_s0  ;;  %s77_s7 = sld [smem:[#allocation3 + %s75_s30]] }
  0x11   : > { %v37_v1 = vld [vmem:[%s36_s6] sm:$0x1]  ;;  %s43_s10 = scalar_lea.vmem %s278_s1, %s42_s19  ;;  %s50_s15 = scalar_lea.vmem %s278_s1, %s49_s21 }
  0x12   : > { %138 = vst.msk [vmem:[%s30_s3 + $0x1] sm:$0x1] %vm31_vm0, %v37_v1  ;;  %v44_v2 = vld [vmem:[%s43_s10] sm:$0x1]  ;;  %s57_s17 = scalar_lea.vmem %s278_s1, %s56_s23  ;;  %p21_p0 = scmp.ge.s32.totalorder %s24_s13, 2  }
  0x13   : > { %140 = vst.msk [vmem:[%s30_s3 + $0x2] sm:$0x1] %vm31_vm0, %v44_v2  ;;  %v51_v3 = vld [vmem:[%s50_s15] sm:$0x1]  ;;  %s64_s19 = scalar_lea.vmem %s278_s1, %s63_s28  ;;  %s88_s28 = sshll.u32 (%p21_p0), %s279_s2, 4  ;;  %s89_s28 = int_to_ptr.hbm [resolvable:$true] %s88_s28 }
  0x14   : > { %142 = vst.msk [vmem:[%s30_s3 + $0x3] sm:$0x1] %vm31_vm0, %v51_v3  ;;  %v58_v4 = vld [vmem:[%s57_s17] sm:$0x1]  ;;  %s71_s21 = scalar_lea.vmem %s278_s1, %s70_s29  ;;  %23 = sbr.rel (!%p21_p0) target bundleno = 7 (0x7), region = 47 }
  0x15   : > { %144 = vst.msk [vmem:[%s30_s3 + $0x4] sm:$0x1] %vm31_vm0, %v58_v4  ;;  %v65_v5 = vld [vmem:[%s64_s19] sm:$0x1]  ;;  %s212_s29 = smov (%p21_p0), [#allocation4]   ;;  %s213_s4 = smov (%p21_p0), 128  }
  0x16   : > { %146 = vst.msk [vmem:[%s30_s3 + $0x5] sm:$0x1] %vm31_vm0, %v65_v5  ;;  %v72_v6 = vld [vmem:[%s71_s21] sm:$0x1]  ;;  %s78_s23 = scalar_lea.vmem %s278_s1, %s77_s7  ;;  %s86_s30 = sshll.u32 (%p21_p0), %s212_s29, 4  ;;  %s87_s30 = int_to_ptr.vmem [resolvable:$true] %s86_s30 }
  0x17   : > { %148 = vst.msk [vmem:[%s30_s3 + $0x6] sm:$0x1] %vm31_vm0, %v72_v6  ;;  %v79_v7 = vld [vmem:[%s78_s23] sm:$0x1]  ;;  %s214_s5 = smov (%p21_p0), 8  }
  0x18   : > { %150 = vst.msk [vmem:[%s30_s3 + $0x7] sm:$0x1] %vm31_vm0, %v79_v7 }
  0x19   :  { %94 = dma.vmem_to_hbm [thread:$0]  %s87_s30, 256, %s89_s28, [#allocation5], %s213_s4, %s213_s4, %s214_s5  }
  0x1a   :  { %205 = dma.done.wait [#allocation5], 256  }
  0x1b   :  { %206 = vsyncadd [#allocation5], 4294967040 }
  0x1c   :  { %99 = vsyncpa [#allocation5], 1 }

</bundles_post_ra>
